<compile_context>
chip_gen: v7x
topology: tpu7x:2x2x1
jax: 0.10.0
libtpu: 0.0.40
codegen_flags: <defaults>
</compile_context>

<pallas_src>
import numpy as np
import jax
import jax.numpy as jnp
from jax import lax
from jax.experimental import pallas as pl
from jax.experimental.pallas import tpu as pltpu


# ------------------------------------------------------------------ small helpers
def _round_up(x, m):
    return (x + m - 1) // m * m


def _padded_bytes(shape, dtype):
    """VMEM footprint of one block, accounting for (sublane, lane) tiling pad."""
    shape = list(shape)
    if len(shape) >= 2:
        shape[-1] = _round_up(shape[-1], 128)
        shape[-2] = _round_up(shape[-2], 8)
    elif len(shape) == 1:
        shape[-1] = _round_up(shape[-1], 128)
    return int(np.prod(shape)) * jnp.dtype(dtype).itemsize


def _vmem_capacity_bytes():
    """Physical VMEM per TensorCore of the actual chip (64 MiB v7x, 128 MiB v5e/v6e)."""
    try:
        return int(pltpu.get_tpu_info().vmem_capacity_bytes)
    except Exception:
        return 128 * 1024 * 1024


def _vmem_limit(need_bytes, budget_bytes):
    return int(min(max(int(need_bytes * 1.4), 16 * 1024 * 1024), budget_bytes))


def _choose_tile(np_total, target):
    """Largest multiple of 128 that divides np_total and is <= target (np_total is a
    multiple of 128 by VFT construction, so 128 always works)."""
    target = max(128, min(int(target), np_total))
    target -= target % 128
    for cand in range(max(target, 128), 127, -128):
        if np_total % cand == 0:
            return cand
    return 128


# ------------------------------------------------------------------- VFT (cached planes)
class VFT:
    """Factorized Vandermonde Fourier transform over an irregular point cloud.

    Builds and caches the stacked forward-VFT planes [Re Vx; Im Vx; Re Vy; Im Vy]
    ONCE per geometry (shared by every spectral layer / forward call), directly in
    `plane_dtype`, never materializing complex64.  `n_align` zero-pads the point
    axis (mathematically inert); set it to your intended N-tile (e.g. 8192) for
    large meshes so the tiled path never re-pads the big arrays.
    """

    def __init__(self, pos_x, pos_y, modes, *, n_align=128, plane_dtype=jnp.bfloat16):
        pos_x = jnp.asarray(pos_x, jnp.float32)
        pos_y = jnp.asarray(pos_y, jnp.float32)
        B, N = pos_x.shape
        self.batch = B
        self.n_points = N
        self.modes = modes
        self.modes_padded = _round_up(modes, 8)         # keep per-mode slices sublane-aligned
        self.n_padded = _round_up(N, max(int(n_align), 128))
        self.plane_dtype = plane_dtype

        k = jnp.arange(modes, dtype=jnp.float32)
        pad = ((0, 0), (0, self.modes_padded - modes), (0, self.n_padded - N))

        def planes(pos):
            phase = 2.0 * jnp.pi * pos[:, None, :] * k[None, :, None]          # (B, M, N)
            # exp(-i*phase): Re = cos, Im = -sin
            return jnp.pad(jnp.cos(phase), pad), jnp.pad(-jnp.sin(phase), pad)

        xr, xi = planes(pos_x)
        yr, yi = planes(pos_y)
        # (B, 4*Mp, Np): the kernels' dominant (and only large) HBM stream.
        self.w_stack = jnp.concatenate([xr, xi, yr, yi], axis=1).astype(plane_dtype)
        # TODO(synk): optionally synthesize these planes in-kernel from pos (EUP cos/sin)
        # per N-tile to eliminate this HBM stream entirely on v5e/v6e.


def _prep_weights(weights1, modes_padded, n_valid):
    """(C_in, C_out, M) complex -> (Mp, C_in, C_out) re/im f32 with the 2/N scale folded
    in.  Tiny (C_in*C_out*M elements); per-call cost is negligible."""
    M = weights1.shape[2]
    w1 = jnp.transpose(jnp.asarray(weights1), (2, 0, 1))       # (M, C_in, C_out)
    if modes_padded != M:
        w1 = jnp.pad(w1, ((0, modes_padded - M), (0, 0), (0, 0)))
    scale = jnp.float32(2.0 / n_valid)                         # folds "x / N * 2"
    return ((jnp.real(w1) * scale).astype(jnp.float32),
            (jnp.imag(w1) * scale).astype(jnp.float32))


# ------------------------------------------------------------------ in-kernel math
def _cmul_stacked(ft, w1r, w1i):
    """compl_mul1d on the stacked forward coefficients (2/N scale folded into w1).

    ft  : (4Mp, C_in) f32 = [xft_r; xft_i; yft_r; yft_i]
    w1* : (Mp, C_in, C_out) f32
    ->    (4Mp, C_out) f32 = [ox_r; ox_i; oy_r; oy_i]
    """
    mp = w1r.shape[0]

    def cmul(fr, fi):
        fr3 = fr[:, :, None]
        fi3 = fi[:, :, None]
        o_r = jnp.sum(fr3 * w1r - fi3 * w1i, axis=1)           # (Mp, C_out)
        o_i = jnp.sum(fr3 * w1i + fi3 * w1r, axis=1)
        return o_r, o_i

    ox_r, ox_i = cmul(ft[0 * mp:1 * mp], ft[1 * mp:2 * mp])
    oy_r, oy_i = cmul(ft[2 * mp:3 * mp], ft[3 * mp:4 * mp])
    return jnp.concatenate([ox_r, ox_i, oy_r, oy_i], axis=0)   # (4Mp, C_out)


# ------------------------------------------------------------------ fused kernel (full N)
def _fused_kernel(x_ref, w_ref, w1r_ref, w1i_ref, out_ref):
    # x_ref  : (1, C_in, Np) f32  native-layout input (lane dim = points)
    # w_ref  : (1, 4Mp, Np)  bf16 stacked VFT planes [Vxr; Vxi; Vyr; Vyi]
    # w1*_ref: (Mp, C_in, C_out) f32, pre-scaled by 2/N
    # out_ref: (1, C_out, Np)
    w = w_ref[0]
    x_bf = x_ref[0].astype(jnp.bfloat16)

    # Forward VFT for all four planes in ONE MXU contraction over the point axis.
    # A @ B^T form (rhs contracted on its last dim) -- native MXU pattern (like q @ k^T).
    ft = lax.dot_general(w, x_bf, dimension_numbers=(((1,), (1,)), ((), ())),
                         preferred_element_type=jnp.float32)          # (4Mp, C_in)

    coef = _cmul_stacked(ft, w1r_ref[...], w1i_ref[...])              # (4Mp, C_out)

    # Inverse VFT + (x + y) sum fused in ONE contraction over the 4Mp mode planes.
    out = lax.dot_general(coef.astype(jnp.bfloat16), w,
                          dimension_numbers=(((0,), (0,)), ((), ())),
                          preferred_element_type=jnp.float32)         # (C_out, Np)
    out_ref[0] = out.astype(out_ref.dtype)


def _fused_need(C_in, C_out, Mp, Np, out_dtype, w_dtype):
    Mp4 = 4 * Mp
    return (2 * _padded_bytes((C_in, Np), jnp.float32)           # x blocks (double-buffered)
            + 2 * _padded_bytes((Mp4, Np), w_dtype)              # w blocks (double-buffered)
            + 2 * _padded_bytes((Mp, C_in, C_out), jnp.float32)  # w1r + w1i (constant -> once each)
            + 2 * _padded_bytes((C_out, Np), out_dtype)          # out blocks (double-buffered)
            + _padded_bytes((Mp4, C_in), jnp.float32)            # ft
            + _padded_bytes((Mp4, C_out), jnp.float32)           # coef
            + 2 * _padded_bytes((Mp, C_in, C_out), jnp.float32)  # cmul temporaries
            + _padded_bytes((Np, 128), w_dtype)                  # allowance: possible x^T relayout
            + _padded_bytes((C_out, Np), jnp.float32))           # inverse result before store


def _run_fused(x, w_stack, w1r, w1i, out_dtype, budget):
    B, C_in, Np = x.shape
    Mp4 = w_stack.shape[1]
    Mp = Mp4 // 4
    C_out = w1r.shape[2]
    need = _fused_need(C_in, C_out, Mp, Np, out_dtype, w_stack.dtype)

    return pl.pallas_call(
        _fused_kernel,
        out_shape=jax.ShapeDtypeStruct((B, C_out, Np), out_dtype),
        grid_spec=pltpu.PrefetchScalarGridSpec(
            num_scalar_prefetch=0,
            grid=(B,),
            in_specs=[pl.BlockSpec((1, C_in, Np), lambda b: (b, 0, 0)),
                      pl.BlockSpec((1, Mp4, Np), lambda b: (b, 0, 0)),
                      pl.BlockSpec((Mp, C_in, C_out), lambda b: (0, 0, 0)),
                      pl.BlockSpec((Mp, C_in, C_out), lambda b: (0, 0, 0))],
            out_specs=pl.BlockSpec((1, C_out, Np), lambda b: (b, 0, 0))),
        compiler_params=pltpu.CompilerParams(
            dimension_semantics=("parallel",),
            vmem_limit_bytes=_vmem_limit(need, budget)),
    )(x, w_stack, w1r, w1i)
    # TODO(synk): for B==1 on v7x, split the 4*Mp mode planes across the two TensorCores.


# ------------------------------------------------------------------ N-tiled two-pass path
def _fwd_coef_kernel(x_ref, w_ref, w1r_ref, w1i_ref, coef_ref, ft_acc):
    # x_ref: (1, C_in, nt) f32   w_ref: (1, 4Mp, nt) bf16
    # coef_ref: (1, 4Mp, C_out) f32 -- resident across the (arbitrary) N-tile axis
    # ft_acc: (4Mp, C_in) f32 VMEM accumulator
    nt = pl.program_id(1)

    @pl.when(nt == 0)
    def _():
        ft_acc[...] = jnp.zeros_like(ft_acc)

    x_bf = x_ref[0].astype(jnp.bfloat16)
    ft_acc[...] += lax.dot_general(w_ref[0], x_bf,
                                   dimension_numbers=(((1,), (1,)), ((), ())),
                                   preferred_element_type=jnp.float32)

    @pl.when(nt == pl.num_programs(1) - 1)
    def _():
        coef_ref[0] = _cmul_stacked(ft_acc[...], w1r_ref[...], w1i_ref[...])


def _inv_kernel(coef_ref, w_ref, out_ref):
    # coef_ref: (1, 4Mp, C_out) f32; w_ref: (1, 4Mp, nt) bf16; out_ref: (1, C_out, nt)
    out = lax.dot_general(coef_ref[0].astype(jnp.bfloat16), w_ref[0],
                          dimension_numbers=(((0,), (0,)), ((), ())),
                          preferred_element_type=jnp.float32)
    out_ref[0] = out.astype(out_ref.dtype)


def _run_tiled(x, w_stack, w1r, w1i, out_dtype, budget, n_tile):
    B, C_in, Np = x.shape
    Mp4 = w_stack.shape[1]
    Mp = Mp4 // 4
    C_out = w1r.shape[2]
    w_dtype = w_stack.dtype

    def need(nt):
        return (2 * _padded_bytes((C_in, nt), jnp.float32)
                + 2 * _padded_bytes((Mp4, nt), w_dtype)
                + 2 * _padded_bytes((Mp, C_in, C_out), jnp.float32)   # w1r + w1i (constant)
                + 2 * _padded_bytes((Mp4, C_out), jnp.float32)        # coef block
                + _padded_bytes((Mp4, C_in), jnp.float32)             # ft accumulator scratch
                + _padded_bytes((nt, 128), w_dtype)                   # allowance: x^T relayout
                + 2 * _padded_bytes((C_out, nt), out_dtype))          # pass-2 out blocks

    nt = _choose_tile(Np, n_tile)
    while nt > 128 and int(need(nt) * 1.2) > budget:
        nt = _choose_tile(Np, nt // 2)
    nsteps = Np // nt
    limit = _vmem_limit(need(nt), budget)

    # ---- pass 1: forward VFT accumulated over N tiles + compl_mul1d -> (B, 4Mp, C_out)
    # NOTE: the N axis MUST stay "arbitrary" -- the coef output block has a constant
    # index_map along it (resident accumulator) and is written only on the last step.
    coef = pl.pallas_call(
        _fwd_coef_kernel,
        out_shape=jax.ShapeDtypeStruct((B, Mp4, C_out), jnp.float32),
        grid_spec=pltpu.PrefetchScalarGridSpec(
            num_scalar_prefetch=0,
            grid=(B, nsteps),
            in_specs=[pl.BlockSpec((1, C_in, nt), lambda b, n: (b, 0, n)),
                      pl.BlockSpec((1, Mp4, nt), lambda b, n: (b, 0, n)),
                      pl.BlockSpec((Mp, C_in, C_out), lambda b, n: (0, 0, 0)),
                      pl.BlockSpec((Mp, C_in, C_out), lambda b, n: (0, 0, 0))],
            out_specs=pl.BlockSpec((1, Mp4, C_out), lambda b, n: (b, 0, 0)),
            scratch_shapes=[pltpu.VMEM((Mp4, C_in), jnp.float32)]),
        compiler_params=pltpu.CompilerParams(
            dimension_semantics=("parallel", "arbitrary"),
            vmem_limit_bytes=limit),
    )(x, w_stack, w1r, w1i)

    # ---- pass 2: inverse VFT (x + y fused inside the contraction) -> (B, C_out, Np)
    out = pl.pallas_call(
        _inv_kernel,
        out_shape=jax.ShapeDtypeStruct((B, C_out, Np), out_dtype),
        grid_spec=pltpu.PrefetchScalarGridSpec(
            num_scalar_prefetch=0,
            grid=(B, nsteps),
            in_specs=[pl.BlockSpec((1, Mp4, C_out), lambda b, n: (b, 0, 0)),
                      pl.BlockSpec((1, Mp4, nt), lambda b, n: (b, 0, n))],
            out_specs=pl.BlockSpec((1, C_out, nt), lambda b, n: (b, 0, n))),
        compiler_params=pltpu.CompilerParams(
            dimension_semantics=("parallel", "parallel"),
            vmem_limit_bytes=limit),
    )(coef, w_stack)
    return out


# ------------------------------------------------------------------ public entry point
def spectral_conv2d_dse(x, vft, weights1, *, out_dtype=jnp.float32,
                        path="auto", n_tile=8192):
    """Forward pass of SpectralConv2d_dse.

    x        : (B, C_in, N) float32 (native PyTorch NCW layout)
    vft      : VFT object built once per geometry (caches the stacked bf16 planes)
    weights1 : (C_in, C_out, modes1) complex
    path     : "auto" | "fused" | "tiled"
    """
    x = jnp.asarray(x, jnp.float32)
    B, C_in, N = x.shape
    if (B, N) != (vft.batch, vft.n_points):
        raise ValueError("x does not match the VFT geometry")
    C_out = weights1.shape[1]
    Mp, Np = vft.modes_padded, vft.n_padded

    w1r, w1i = _prep_weights(weights1, Mp, N)        # tiny; 2/N folded in
    if Np != N:                                      # zero point-columns are inert
        x = jnp.pad(x, ((0, 0), (0, 0), (0, Np - N)))

    budget = int(_vmem_capacity_bytes() * 0.85)      # 64 MiB v7x / 128 MiB v5e,v6e capped
    fused_fits = int(_fused_need(C_in, C_out, Mp, Np, out_dtype,
                                 vft.w_stack.dtype) * 1.15) <= budget

    if path == "fused" or (path == "auto" and fused_fits):
        out = _run_fused(x, vft.w_stack, w1r, w1i, out_dtype, budget)
    else:
        out = _run_tiled(x, vft.w_stack, w1r, w1i, out_dtype, budget, n_tile)
    return out[:, :, :N]


# ------------------------------------------------------------------- numpy reference
def reference_forward_np(x, pos_x, pos_y, modes, weights1):
    x = np.asarray(x, dtype=np.complex128)
    k = np.arange(modes, dtype=np.float64)

    def vand(pos):
        phase = 2.0 * np.pi * np.asarray(pos, np.float64)[:, None, :] * k[None, :, None]
        return np.exp(-1j * phase)                                  # (B, M, N)

    vx, vy = vand(pos_x), vand(pos_y)
    w1 = np.asarray(weights1, dtype=np.complex128)
    xp = np.transpose(x, (0, 2, 1))                                 # permute(0, 2, 1)
    x_ft = np.einsum('bmn,bnc->bmc', vx, xp)                        # transformer.forward
    y_ft = np.einsum('bmn,bnc->bmc', vy, xp)
    x_ft = np.transpose(x_ft, (0, 2, 1))
    y_ft = np.transpose(y_ft, (0, 2, 1))
    ox = np.einsum('bix,iox->box', x_ft, w1)                        # compl_mul1d
    oy = np.einsum('bix,iox->box', y_ft, w1)
    ox = np.transpose(ox, (0, 2, 1))
    oy = np.transpose(oy, (0, 2, 1))
    vx_inv = np.conjugate(np.transpose(vx, (0, 2, 1)))              # transformer.inverse
    vy_inv = np.conjugate(np.transpose(vy, (0, 2, 1)))
    z = np.einsum('bnm,bmc->bnc', vx_inv, ox) + np.einsum('bnm,bmc->bnc', vy_inv, oy)
    z = np.transpose(z, (0, 2, 1))
    z = z / z.shape[-1] * 2
    return np.real(z).astype(np.float32)


# ----------------------------------------------------------------------------- main
if __name__ == "__main__":
    B, C_in, C_out, N, modes1 = 2, 4, 4, 16, 8

    key = jax.random.PRNGKey(0)
    k1, k2, k3, k4, k5 = jax.random.split(key, 5)

    x = jax.random.normal(k1, (B, C_in, N), dtype=jnp.float32)
    pos_x = jax.random.uniform(k2, (B, N), dtype=jnp.float32)
    pos_y = jax.random.uniform(k3, (B, N), dtype=jnp.float32)

    scale = 1.0 / (C_in * C_out)
    weights1 = (scale * (jax.random.uniform(k4, (C_in, C_out, modes1), dtype=jnp.float32)
                         + 1j * jax.random.uniform(k5, (C_in, C_out, modes1), dtype=jnp.float32))
                ).astype(jnp.complex64)
    # TODO(synk): weights2 exists in the PyTorch module but is never used in forward(); omitted.

    vft = VFT(pos_x, pos_y, modes1)                 # built ONCE per geometry (cached planes)
    ref = reference_forward_np(x, pos_x, pos_y, modes1, weights1)

    # auto-dispatch (fused single-pass path at these shapes)
    out = jax.block_until_ready(spectral_conv2d_dse(x, vft, weights1))
    np.testing.assert_allclose(np.asarray(out), ref, rtol=5e-2, atol=5e-2)

    # forced N-tiled two-pass path, single tile
    out_t = jax.block_until_ready(
        spectral_conv2d_dse(x, vft, weights1, path="tiled", n_tile=128))
    np.testing.assert_allclose(np.asarray(out_t), ref, rtol=5e-2, atol=5e-2)

    # N-tiled path with multiple tiles (exercises the cross-tile forward accumulator)
    N2 = 320
    x2 = jax.random.normal(k1, (B, C_in, N2), dtype=jnp.float32)
    px2 = jax.random.uniform(k2, (B, N2), dtype=jnp.float32)
    py2 = jax.random.uniform(k3, (B, N2), dtype=jnp.float32)
    vft2 = VFT(px2, py2, modes1)
    ref2 = reference_forward_np(x2, px2, py2, modes1, weights1)
    out2 = jax.block_until_ready(
        spectral_conv2d_dse(x2, vft2, weights1, path="tiled", n_tile=128))
    np.testing.assert_allclose(np.asarray(out2), ref2, rtol=5e-2, atol=5e-2)

    print("KERNEL_OK")
</pallas_src>

<mosaic_0001>
module attributes {stable_mosaic.version = 11 : i64} {
  func.func @_fused_kernel(%arg0: i32, %arg1: memref<1x4x128xf32, #tpu.memory_space<vmem>>, %arg2: memref<1x32x128xbf16, #tpu.memory_space<vmem>>, %arg3: memref<8x4x4xf32, #tpu.memory_space<vmem>>, %arg4: memref<8x4x4xf32, #tpu.memory_space<vmem>>, %arg5: memref<1x4x128xf32, #tpu.memory_space<vmem>>) attributes {dimension_semantics = [#tpu.dimension_semantics<parallel>], iteration_bounds = array<i64: 2>, scalar_prefetch = 0 : i64, scratch_operands = 0 : i64, tpu.core_type = #tpu.core_type<tc>, window_params = [{transform_indices = @transform_0, window_bounds = array<i64: 1, 4, 128>}, {transform_indices = @transform_1, window_bounds = array<i64: 1, 32, 128>}, {pipeline_mode = #tpu.pipeline_mode<synchronous>, transform_indices = @transform_2, window_bounds = array<i64: 8, 4, 4>}, {pipeline_mode = #tpu.pipeline_mode<synchronous>, transform_indices = @transform_3, window_bounds = array<i64: 8, 4, 4>}, {transform_indices = @transform_4, window_bounds = array<i64: 1, 4, 128>}]} {
    %c0 = arith.constant 0 : index
    %c0_0 = arith.constant 0 : index
    %c0_1 = arith.constant 0 : index
    %0 = vector.load %arg2[%c0, %c0_0, %c0_1] : memref<1x32x128xbf16, #tpu.memory_space<vmem>>, vector<1x32x128xbf16>
    %1 = vector.shape_cast %0 : vector<1x32x128xbf16> to vector<32x128xbf16>
    %c0_2 = arith.constant 0 : index
    %c0_3 = arith.constant 0 : index
    %c0_4 = arith.constant 0 : index
    %2 = vector.load %arg1[%c0_2, %c0_3, %c0_4] : memref<1x4x128xf32, #tpu.memory_space<vmem>>, vector<1x4x128xf32>
    %3 = vector.shape_cast %2 : vector<1x4x128xf32> to vector<4x128xf32>
    %4 = arith.truncf %3 : vector<4x128xf32> to vector<4x128xbf16>
    %cst = arith.constant dense<0.000000e+00> : vector<32x4xf32>
    %5 = tpu.matmul %1, %4, %cst {dimension_numbers = #tpu.dot_dimension_numbers<[1], [1], [0], [0], [0, 0, 1, 0], [], []>} : vector<32x128xbf16>, vector<4x128xbf16>, vector<32x4xf32> -> vector<32x4xf32>
    %c0_5 = arith.constant 0 : index
    %c0_6 = arith.constant 0 : index
    %c0_7 = arith.constant 0 : index
    %6 = vector.load %arg3[%c0_5, %c0_6, %c0_7] : memref<8x4x4xf32, #tpu.memory_space<vmem>>, vector<8x4x4xf32>
    %c0_8 = arith.constant 0 : index
    %c0_9 = arith.constant 0 : index
    %c0_10 = arith.constant 0 : index
    %7 = vector.load %arg4[%c0_8, %c0_9, %c0_10] : memref<8x4x4xf32, #tpu.memory_space<vmem>>, vector<8x4x4xf32>
    %8 = vector.extract_strided_slice %5 {offsets = [0, 0], sizes = [8, 4], strides = [1, 1]} : vector<32x4xf32> to vector<8x4xf32>
    %9 = vector.extract_strided_slice %5 {offsets = [8, 0], sizes = [8, 4], strides = [1, 1]} : vector<32x4xf32> to vector<8x4xf32>
    %10 = vector.shape_cast %8 : vector<8x4xf32> to vector<8x4x1xf32>
    %11 = vector.shape_cast %9 : vector<8x4xf32> to vector<8x4x1xf32>
    %12 = vector.broadcast %10 : vector<8x4x1xf32> to vector<8x4x4xf32>
    %13 = arith.mulf %12, %6 : vector<8x4x4xf32>
    %14 = vector.broadcast %11 : vector<8x4x1xf32> to vector<8x4x4xf32>
    %15 = arith.mulf %14, %7 : vector<8x4x4xf32>
    %16 = arith.subf %13, %15 : vector<8x4x4xf32>
    %cst_11 = arith.constant dense<0.000000e+00> : vector<8x4xf32>
    %17 = vector.multi_reduction <add>, %16, %cst_11 [1] : vector<8x4x4xf32> to vector<8x4xf32>
    %18 = vector.broadcast %10 : vector<8x4x1xf32> to vector<8x4x4xf32>
    %19 = arith.mulf %18, %7 : vector<8x4x4xf32>
    %20 = vector.broadcast %11 : vector<8x4x1xf32> to vector<8x4x4xf32>
    %21 = arith.mulf %20, %6 : vector<8x4x4xf32>
    %22 = arith.addf %19, %21 : vector<8x4x4xf32>
    %cst_12 = arith.constant dense<0.000000e+00> : vector<8x4xf32>
    %23 = vector.multi_reduction <add>, %22, %cst_12 [1] : vector<8x4x4xf32> to vector<8x4xf32>
    %24 = vector.extract_strided_slice %5 {offsets = [16, 0], sizes = [8, 4], strides = [1, 1]} : vector<32x4xf32> to vector<8x4xf32>
    %25 = vector.extract_strided_slice %5 {offsets = [24, 0], sizes = [8, 4], strides = [1, 1]} : vector<32x4xf32> to vector<8x4xf32>
    %26 = vector.shape_cast %24 : vector<8x4xf32> to vector<8x4x1xf32>
    %27 = vector.shape_cast %25 : vector<8x4xf32> to vector<8x4x1xf32>
    %28 = vector.broadcast %26 : vector<8x4x1xf32> to vector<8x4x4xf32>
    %29 = arith.mulf %28, %6 : vector<8x4x4xf32>
    %30 = vector.broadcast %27 : vector<8x4x1xf32> to vector<8x4x4xf32>
    %31 = arith.mulf %30, %7 : vector<8x4x4xf32>
    %32 = arith.subf %29, %31 : vector<8x4x4xf32>
    %cst_13 = arith.constant dense<0.000000e+00> : vector<8x4xf32>
    %33 = vector.multi_reduction <add>, %32, %cst_13 [1] : vector<8x4x4xf32> to vector<8x4xf32>
    %34 = vector.broadcast %26 : vector<8x4x1xf32> to vector<8x4x4xf32>
    %35 = arith.mulf %34, %7 : vector<8x4x4xf32>
    %36 = vector.broadcast %27 : vector<8x4x1xf32> to vector<8x4x4xf32>
    %37 = arith.mulf %36, %6 : vector<8x4x4xf32>
    %38 = arith.addf %35, %37 : vector<8x4x4xf32>
    %cst_14 = arith.constant dense<0.000000e+00> : vector<8x4xf32>
    %39 = vector.multi_reduction <add>, %38, %cst_14 [1] : vector<8x4x4xf32> to vector<8x4xf32>
    %40 = tpu.concatenate %17, %23, %33, %39 in 0 : vector<8x4xf32>, vector<8x4xf32>, vector<8x4xf32>, vector<8x4xf32> -> vector<32x4xf32>
    %41 = arith.truncf %40 : vector<32x4xf32> to vector<32x4xbf16>
    %cst_15 = arith.constant dense<0.000000e+00> : vector<4x128xf32>
    %42 = tpu.matmul %41, %1, %cst_15 {dimension_numbers = #tpu.dot_dimension_numbers<[0], [0], [1], [1], [0, 1, 1, 1], [], []>} : vector<32x4xbf16>, vector<32x128xbf16>, vector<4x128xf32> -> vector<4x128xf32>
    %c0_16 = arith.constant 0 : index
    %c0_17 = arith.constant 0 : index
    %c0_18 = arith.constant 0 : index
    %43 = vector.load %arg5[%c0_16, %c0_17, %c0_18] : memref<1x4x128xf32, #tpu.memory_space<vmem>>, vector<1x4x128xf32>
    %44 = vector.shape_cast %43 : vector<1x4x128xf32> to vector<4x128xf32>
    %45 = vector.shape_cast %42 : vector<4x128xf32> to vector<1x4x128xf32>
    tpu.vector_store %arg5[%c0_16, %c0_17, %c0_18], %45 {strides = array<i32>} : memref<1x4x128xf32, #tpu.memory_space<vmem>>, vector<1x4x128xf32>,
    return
  }
  func.func @transform_0(%arg0: i32) -> (i32, i32, i32) {
    %c0_i32 = arith.constant 0 : i32
    %c0_i32_0 = arith.constant 0 : i32
    %c0_i32_1 = arith.constant 0 : i32
    return %arg0, %c0_i32, %c0_i32_0 : i32, i32, i32
  }
  func.func @transform_1(%arg0: i32) -> (i32, i32, i32) {
    %c0_i32 = arith.constant 0 : i32
    %c0_i32_0 = arith.constant 0 : i32
    %c0_i32_1 = arith.constant 0 : i32
    return %arg0, %c0_i32, %c0_i32_0 : i32, i32, i32
  }
  func.func @transform_2(%arg0: i32) -> (i32, i32, i32) {
    %c0_i32 = arith.constant 0 : i32
    %c0_i32_0 = arith.constant 0 : i32
    %c0_i32_1 = arith.constant 0 : i32
    %c0_i32_2 = arith.constant 0 : i32
    return %c0_i32, %c0_i32_0, %c0_i32_1 : i32, i32, i32
  }
  func.func @transform_3(%arg0: i32) -> (i32, i32, i32) {
    %c0_i32 = arith.constant 0 : i32
    %c0_i32_0 = arith.constant 0 : i32
    %c0_i32_1 = arith.constant 0 : i32
    %c0_i32_2 = arith.constant 0 : i32
    return %c0_i32, %c0_i32_0, %c0_i32_1 : i32, i32, i32
  }
  func.func @transform_4(%arg0: i32) -> (i32, i32, i32) {
    %c0_i32 = arith.constant 0 : i32
    %c0_i32_0 = arith.constant 0 : i32
    %c0_i32_1 = arith.constant 0 : i32
    return %arg0, %c0_i32, %c0_i32_0 : i32, i32, i32
  }
}

</mosaic_0001>

<bundles_post_ra>
// kernel: tpu_custom_call.1
= control target key start
LH: loop header
LB: loop body
LE: loop exit
PB: predicated region body
PF: predicated region fallthrough
CT: control target
= control target key end

     0   :  { %9 = vsyncpa [#allocation3], 0  ;;  %s1664_s0 = inlined_call_operand.vmem [shape: f32[2,4,128], index: 0, kind: input, shape index: {}]   ;;  %s1665_s1 = inlined_call_operand.vmem [shape: bf16[2,32,128], index: 1, kind: input, shape index: {}]   ;;  %s1666_s2 = inlined_call_operand.vmem [shape: f32[8,4,4], index: 2, kind: input, shape index: {}]   ;;  %s1667_s3 = inlined_call_operand.vmem [shape: f32[8,4,4], index: 3, kind: input, shape index: {}]   ;;  %s1668_s4 = inlined_call_operand.hbm [shape: f32[2,4,128], index: 4, kind: output, shape index: {}]  }
   0x1   :  { %11 = vsyncpa [#allocation3 + $0x1], 0  ;;  %s1233_s15 = smov 0   ;;  %s1235_s16 = smov 0  }
   0x2   :  { %s1237_s17 = smov 0   ;;  %s1239_s18 = smov 0  }
   0x3 LB: > { %s1254_s19 = sadd.s32 4294967295, %s1203_s18   ;;  %s1061_s20 = sadd.s32 4294967294, %s1203_s18   ;;  %s1203_s18 = sphi %s1239_s18, %s1674_s18   ;;  %s1199_s17 = sphi %s1237_s17, %s1673_s17   ;;  %s1195_s16 = sphi %s1235_s16, %s1672_s16   ;;  %s1191_s15 = sphi %s1233_s15, %s1671_s15  }
   0x4   : > { %s1258_s21 = sadd.s32 1, %s1203_s18   ;;  %s118_s22 = sadd.s32 1, %s1199_s17 }
   0x5   : > { %s115_s23 = ssub.s32 %s1203_s18, %s1258_s21  ;;  %p128_p0 = scmp.ne.s32.totalorder %s1199_s17, %s1195_s16 }
   0x6   : > { %p116_p1 = scmp.eq.s32.totalorder %s115_s23, 0  ;;  %p129_p2 = scmp.eq.s32.totalorder %s1254_s19, 1 }
   0x7   : > { %p134_p3 = scmp.ne.s32.totalorder %s1195_s16, %s1191_s15  ;;  %p135_p4 = scmp.eq.s32.totalorder %s1061_s20, 1 }
   0x8   : > { %s1269_s24 = scalar_select %p116_p1, %s1199_s17, %s118_s22  }
   0x9   : > { %p1271_p5 = por %p129_p2, %p128_p0  ;;  %p1275_p6 = por %p135_p4, %p134_p3 }
   0xa   : > { %p1064_p7 = scmp.ge.s32.totalorder %s1203_s18, 1  ;;  %p174_p8 = scmp.lt.s32.totalorder %s1203_s18, 3 }
   0xc   : > { %p175_p9 = pnand %p1064_p7, %p174_p8 }
   0xd   : > { %p204_p10 = scmp.lt.s32.totalorder (!%p175_p9), %s1254_s19, 1  ;;  %v297_v4 = vlaneseq (!%p175_p9)  ;;  %v1205_v50 = vmov (!%p175_p9), 0.0   ;;  %vm1206_vm0 = vmmov (!%p175_p9), 0   ;;  %v1326_v53 = vld [vmem:[%s1666_s2 + $0x4] sm:$0xf] (!%p175_p9)  ;;  %vm433_vm1 = vcmask (!%p175_p9), 27648  }
   0xe   : > { %178 = sbr.rel (%p175_p9) target bundleno = 790 (0x316), region = 36  ;;  %1089 = vmatprep.subr.bf16.mxu1 (!%p175_p9), %v1205_v50  ;;  %1093 = vmatprep.mubr.msk.bf16.mxu1 (!%p175_p9), %vm1206_vm0, %v1205_v50  ;;  %v1331_v54 = vld [vmem:[%s1667_s3 + $0x4] sm:$0xf] (!%p175_p9)  ;;  %v1340_v61 = vld [vmem:[%s1666_s2 + $0x8] sm:$0xf] (!%p175_p9)  ;;  %vm850_vm2 = vcmask (!%p175_p9), 1041409  }
   0xf   : > { %v298_v5 = vshrl.u32 (!%p175_p9), %v297_v4, 7  ;;  %v1345_v62 = vld [vmem:[%s1667_s3 + $0x8] sm:$0xf] (!%p175_p9)  ;;  %vm852_vm3 = vcmask (!%p175_p9), 1042434   ;;  %vm854_vm4 = vcmask (!%p175_p9), 1043459   ;;  %vm856_vm5 = vcmask (!%p175_p9), 1044484  }
  0x10   : > { %vm858_vm6 = vcmask (!%p175_p9), 1045509   ;;  %vm860_vm7 = vcmask (!%p175_p9), 1046534   ;;  %vm862_vm8 = vcmask (!%p175_p9), 1047559   ;;  %vm931_vm9 = vcmask (!%p175_p9), 261120   ;;  %s201_s8 = sand.u32 (!%p175_p9), 1, %s1195_s16   ;;  %s1073_s12 = sshll.u32 (!%p175_p9), %s1254_s19, 6 }
  0x11   : > { %v306_v6 = vsub.s32 (!%p175_p9), 1, %v298_v5  ;;  %v1295_v7 = vsub.s32 (!%p175_p9), 0, %v298_v5  ;;  %v313_v12 = vsub.s32 (!%p175_p9), 2, %v298_v5  ;;  %v320_v17 = vsub.s32 (!%p175_p9), 3, %v298_v5  ;;  %s1624_s20 = scalar_lea.hbm (!%p175_p9), %s1668_s4, %s1073_s12  ;;  %s977_s22 = scalar_lea.sflag (!%p175_p9), [#allocation3], %s201_s8 }
  0x12   : > { %v327_v20 = vsub.s32 (!%p175_p9), 4, %v298_v5  ;;  %v334_v23 = vsub.s32 (!%p175_p9), 5, %v298_v5  ;;  %v341_v28 = vsub.s32 (!%p175_p9), 6, %v298_v5  ;;  %v348_v41 = vsub.s32 (!%p175_p9), 7, %v298_v5 }
  0x15   : > { %s205_s27 = scalar_select %p204_p10, %s1254_s19, 1 }
  0x16   : > { %s1207_s19 = smov [#allocation2]  }
  0x17   : > { %s1066_s28 = sshll.u32 %s205_s27, 2  ;;  %s1076_s29 = sshll.u32 %s205_s27, 4 }
  0x18   : > { %s207_s6 = scalar_lea.vmem %s1664_s0, %s1066_s28  ;;  %s212_s9 = scalar_lea.vmem %s1665_s1, %s1076_s29 }
  0x19   : > { %v218_v0 = vld [vmem:[%s207_s6] sm:$0xf]  ;;  %v1292_v3 = vld [vmem:[%s212_s9 + $0x8] sm:$0xff]   ;;  %s1145_s27 = sshll.u32 %s1207_s19, 4  ;;  %s1146_s27 = int_to_ptr.vmem [resolvable:$false] %s1145_s27 }
  0x1a   : > { %v219_v1 = vpack.c.bf16 %v218_v0, %v218_v0  ;;  %v1289_v2 = vld [vmem:[%s212_s9] sm:$0xff]   ;;  %s1065_s9 = sshll.u32 %s201_s8, 2  ;;  %s1147_s28 = scalar_lea.vmem %s1146_s27, 128 }
  0x1b   : > { %1085 = vmatprep.mubr.bf16.mxu0 %v1289_v2  ;;  %1090 = vmatpush3.bf16.msra.mxu1 %v1289_v2  ;;  %s203_s10 = scalar_lea.vmem [#allocation2], %s1065_s9 }
  0x1c   : > { %1083 = vmatprep.subr.bf16.mxu0 %v219_v1  ;;  %1091 = vmatprep.subr.bf16.mxu1 %v1205_v50  ;;  %s990_s11 = sshll.u32 %s203_s10, 4  ;;  %s1619_s11 = int_to_ptr.vmem [resolvable:$true] %s990_s11 }
  0x1d   : > { %1084 = vmatpush3.bf16.xpose.msra.mxu0 %v219_v1  ;;  %v1350_v1 = vld [vmem:[%s1666_s2] sm:$0xf]  ;;  %s1141_s23 = scalar_lea.vmem %s1619_s11, 64  ;;  %p1148_p0 = scmp.lt.s32.totalorder %s1619_s11, %s1146_s27 }
  0x1e   : > { %p1142_p11 = scmp.ne.s32.totalorder %s1619_s11, %s1141_s23  ;;  %p1149_p1 = scmp.lt.s32.totalorder %s1147_s28, %s1141_s23 }
  0x1f   : > { %1092 = vmatpush3.bf16.msra.mxu1 %v1292_v3 }
  0x20   : > { %p1143_p12 = pnand %p1142_p11, %p1271_p5  ;;  %p1150_p2 = por %p1149_p1, %p1148_p0 }
  0x22   : > { %p1144_p13 = pneg %p1143_p12 }
  0x24   : > { %1086 = vmatmul.mubr.bf16.vlgmr.msra.gmra.mrb[0].mxu0 %v1292_v3  ;;  %p1151_p3 = pnand %p1150_p2, %p1144_p13 }
  0xf7   : > { %v1297_v8 = vpop.f32.mrb[0].mxu0 }
  0xf8   : > { %v266_v9 = vpop.f32.mrb[1].mxu0  ;;  %v580_v10 = vrot.slane %v1297_v8, %v306_v6  ;;  %v573_v11 = vrot.slane %v1297_v8, %v1295_v7  ;;  %v587_v15 = vrot.slane %v1297_v8, %v313_v12  ;;  %v594_v18 = vrot.slane %v1297_v8, %v320_v17 }
  0xf9   : > { %v1302_v13 = vpop.f32.mrb[2].mxu0  ;;  %v601_v21 = vrot.slane %v1297_v8, %v327_v20  ;;  %v608_v24 = vrot.slane %v1297_v8, %v334_v23  ;;  %v300_v26 = vrot.slane %v266_v9, %v1295_v7  ;;  %v307_v29 = vrot.slane %v266_v9, %v306_v6 }
  0xfa   : > { %582 = vbcast.lane.b32.xlu1 %v580_v10, 256  ;;  %575 = vbcast.lane.b32.xlu0 %v573_v11, 256  ;;  %v269_v14 = vpop.f32.mrb[3].mxu0  ;;  %v636_v16 = vrot.slane %v1302_v13, %v306_v6  ;;  %v643_v19 = vrot.slane %v1302_v13, %v313_v12  ;;  %v650_v22 = vrot.slane %v1302_v13, %v320_v17  ;;  %v1359_v10 = vld [vmem:[%s1666_s2 + $0xc] sm:$0xf] }
  0xfb   : > { %v657_v25 = vrot.slane %v1302_v13, %v327_v20  ;;  %v664_v27 = vrot.slane %v1302_v13, %v334_v23  ;;  %v671_v30 = vrot.slane %v1302_v13, %v341_v28  ;;  %v314_v31 = vrot.slane %v266_v9, %v313_v12  ;;  %v1364_v11 = vld [vmem:[%s1667_s3 + $0xc] sm:$0xf] }
  0xfc   : > { %v356_v32 = vrot.slane %v269_v14, %v1295_v7  ;;  %v321_v33 = vrot.slane %v266_v9, %v320_v17  ;;  %v363_v34 = vrot.slane %v269_v14, %v306_v6  ;;  %v328_v35 = vrot.slane %v266_v9, %v327_v20 }
  0xfd   : > { %v370_v36 = vrot.slane %v269_v14, %v313_v12  ;;  %v335_v37 = vrot.slane %v266_v9, %v334_v23  ;;  %v377_v38 = vrot.slane %v269_v14, %v320_v17  ;;  %v342_v39 = vrot.slane %v266_v9, %v341_v28 }
  0xfe   : > { %589 = vbcast.lane.b32.xlu0 %v587_v15, 256  ;;  %638 = vbcast.lane.b32.xlu1 %v636_v16, 256  ;;  %v384_v40 = vrot.slane %v269_v14, %v327_v20  ;;  %v349_v42 = vrot.slane %v266_v9, %v348_v41  ;;  %v391_v43 = vrot.slane %v269_v14, %v334_v23 }
  0xff   : > { %v629_v44 = vrot.slane %v1302_v13, %v1295_v7  ;;  %v398_v45 = vrot.slane %v269_v14, %v341_v28  ;;  %v615_v46 = vrot.slane %v1297_v8, %v341_v28  ;;  %v405_v47 = vrot.slane %v269_v14, %v348_v41 }
 0x100   : > { %v622_v48 = vrot.slane %v1297_v8, %v348_v41  ;;  %v678_v49 = vrot.slane %v1302_v13, %v348_v41 }
 0x102   : > { %596 = vbcast.lane.b32.xlu0 %v594_v18, 256  ;;  %645 = vbcast.lane.b32.xlu1 %v643_v19, 256 }
 0x106   : > { %603 = vbcast.lane.b32.xlu0 %v601_v21, 256  ;;  %652 = vbcast.lane.b32.xlu1 %v650_v22, 256  ;;  %v1374_v21 = vld [vmem:[%s1667_s3] sm:$0xf] }
 0x10a   : > { %610 = vbcast.lane.b32.xlu0 %v608_v24, 256  ;;  %659 = vbcast.lane.b32.xlu1 %v657_v25, 256  ;;  %v1381_v24 = vld [vmem:[%s1666_s2 + $0x10] sm:$0xf] }
 0x10e   : > { %302 = vbcast.lane.b32.xlu0 %v300_v26, 256  ;;  %666 = vbcast.lane.b32.xlu1 %v664_v27, 256 }
 0x112   : > { %309 = vbcast.lane.b32.xlu0 %v307_v29, 256  ;;  %673 = vbcast.lane.b32.xlu1 %v671_v30, 256 }
 0x116   : > { %316 = vbcast.lane.b32.xlu0 %v314_v31, 256  ;;  %358 = vbcast.lane.b32.xlu1 %v356_v32, 256 }
 0x11a   : > { %323 = vbcast.lane.b32.xlu0 %v321_v33, 256  ;;  %365 = vbcast.lane.b32.xlu1 %v363_v34, 256 }
 0x11e   : > { %330 = vbcast.lane.b32.xlu0 %v328_v35, 256  ;;  %372 = vbcast.lane.b32.xlu1 %v370_v36, 256 }
 0x122   : > { %337 = vbcast.lane.b32.xlu0 %v335_v37, 256  ;;  %379 = vbcast.lane.b32.xlu1 %v377_v38, 256  ;;  %v1393_v38 = vld [vmem:[%s1667_s3 + $0x10] sm:$0xf] }
 0x126   : > { %344 = vbcast.lane.b32.xlu0 %v342_v39, 256  ;;  %386 = vbcast.lane.b32.xlu1 %v384_v40, 256  ;;  %v1399_v40 = vld [vmem:[%s1666_s2 + $0x14] sm:$0xf] }
 0x12a   : > { %351 = vbcast.lane.b32.xlu0 %v349_v42, 256  ;;  %393 = vbcast.lane.b32.xlu1 %v391_v43, 256 }
 0x12e   : > { %631 = vbcast.lane.b32.xlu0 %v629_v44, 256  ;;  %400 = vbcast.lane.b32.xlu1 %v398_v45, 256 }
 0x132   : > { %617 = vbcast.lane.b32.xlu0 %v615_v46, 256  ;;  %407 = vbcast.lane.b32.xlu1 %v405_v47, 256  ;;  %v1406_v47 = vld [vmem:[%s1667_s3 + $0x14] sm:$0xf] }
 0x136   : > { %624 = vbcast.lane.b32.xlu0 %v622_v48, 256  ;;  %680 = vbcast.lane.b32.xlu1 %v678_v49, 256 }
 0x16c   : > { %v583_v51 = vpop.permute.xlu1 %582  ;;  %v576_v52 = vpop.permute.xlu0 %575 }
 0x16d   : > { %v683_v57 = vmul.f32 %v583_v51, %v1326_v53  ;;  %v763_v58 = vmul.f32 %v583_v51, %v1331_v54  ;;  %v1369_v14 = vmul.f32 %v576_v52, %v1350_v1  ;;  %v1388_v35 = vmul.f32 %v576_v52, %v1374_v21 }
 0x170   : > { %v590_v55 = vpop.permute.xlu0 %589  ;;  %v639_v56 = vpop.permute.xlu1 %638 }
 0x171   : > { %v691_v59 = vmul.f32 %v639_v56, %v1331_v54  ;;  %v771_v60 = vmul.f32 %v639_v56, %v1326_v53  ;;  %v684_v4 = vmul.f32 %v590_v55, %v1340_v61  ;;  %v764_v5 = vmul.f32 %v590_v55, %v1345_v62 }
 0x173   : > { %v699_v63 = vsub.f32 %v683_v57, %v691_v59  ;;  %v779_v0 = vadd.f32 %v771_v60, %v763_v58 }
 0x174   : > { %v597_v2 = vpop.permute.xlu0 %596  ;;  %v646_v3 = vpop.permute.xlu1 %645 }
 0x175   : > { %v713_v6 = vsel %vm433_vm1, %v699_v63, 0.0  ;;  %v793_v7 = vsel %vm433_vm1, %v779_v0, 0.0  ;;  %v692_v12 = vmul.f32 %v646_v3, %v1345_v62  ;;  %v772_v13 = vmul.f32 %v646_v3, %v1340_v61 }
 0x176   : > { %v714_v8 = vrot.slane %v713_v6, 4  ;;  %v794_v9 = vrot.slane %v793_v7, 4  ;;  %v685_v22 = vmul.f32 %v597_v2, %v1359_v10  ;;  %v765_v23 = vmul.f32 %v597_v2, %v1364_v11 }
 0x177   : > { %v700_v17 = vsub.f32 %v684_v4, %v692_v12  ;;  %v780_v18 = vadd.f32 %v772_v13, %v764_v5 }
 0x178   : > { %v715_v15 = vadd.f32 %v714_v8, %v713_v6  ;;  %v795_v16 = vadd.f32 %v794_v9, %v793_v7  ;;  %v604_v19 = vpop.permute.xlu0 %603  ;;  %v653_v20 = vpop.permute.xlu1 %652 }
 0x179   : > { %v693_v25 = vmul.f32 %v653_v20, %v1364_v11  ;;  %v773_v26 = vmul.f32 %v653_v20, %v1359_v10  ;;  %v720_v29 = vsel %vm433_vm1, %v700_v17, 0.0  ;;  %v800_v30 = vsel %vm433_vm1, %v780_v18, 0.0 }
 0x17a   : > { %v716_v27 = vrot.slane %v715_v15, 2  ;;  %v796_v28 = vrot.slane %v795_v16, 2  ;;  %v721_v31 = vrot.slane %v720_v29, 4  ;;  %v801_v32 = vrot.slane %v800_v30, 4 }
 0x17b   : > { %v701_v33 = vsub.f32 %v685_v22, %v693_v25  ;;  %v781_v34 = vadd.f32 %v773_v26, %v765_v23  ;;  %v686_v39 = vmul.f32 %v604_v19, %v1381_v24  ;;  %v766_v56 = vmul.f32 %v604_v19, %v1393_v38 }
 0x17c   : > { %v717_v36 = vadd.f32 %v716_v27, %v715_v15  ;;  %v797_v37 = vadd.f32 %v796_v28, %v795_v16  ;;  %v611_v41 = vpop.permute.xlu0 %610  ;;  %v660_v42 = vpop.permute.xlu1 %659  ;;  %v722_v43 = vadd.f32 %v721_v31, %v720_v29  ;;  %v802_v44 = vadd.f32 %v801_v32, %v800_v30 }
 0x17d   : > { %v727_v45 = vsel %vm433_vm1, %v701_v33, 0.0  ;;  %v807_v46 = vsel %vm433_vm1, %v781_v34, 0.0  ;;  %v687_v57 = vmul.f32 %v611_v41, %v1399_v40  ;;  %v767_v63 = vmul.f32 %v611_v41, %v1406_v47  ;;  %v1428_v34 = vld [vmem:[%s1667_s3 + $0x18] sm:$0xf] }
 0x17e   : > { %v718_v48 = vrot.slane %v717_v36, 1  ;;  %v798_v49 = vrot.slane %v797_v37, 1  ;;  %v728_v50 = vrot.slane %v727_v45, 4  ;;  %v808_v51 = vrot.slane %v807_v46, 4 }
 0x17f   : > { %v723_v52 = vrot.slane %v722_v43, 2  ;;  %v803_v55 = vrot.slane %v802_v44, 2  ;;  %v694_v5 = vmul.f32 %v660_v42, %v1393_v38  ;;  %v774_v6 = vmul.f32 %v660_v42, %v1381_v24 }
 0x180   : > { %v1410_v58 = vadd.f32 %v718_v48, %v717_v36  ;;  %v729_v59 = vadd.f32 %v728_v50, %v727_v45  ;;  %v809_v60 = vadd.f32 %v808_v51, %v807_v46  ;;  %v303_v0 = vpop.permute.xlu0 %302  ;;  %v667_v2 = vpop.permute.xlu1 %666  ;;  %v1415_v7 = vadd.f32 %v798_v49, %v797_v37  ;;  %v1439_v46 = vld [vmem:[%s1666_s2 + $0x18] sm:$0xf] }
 0x181   : > { %v724_v3 = vadd.f32 %v723_v52, %v722_v43  ;;  %v804_v4 = vadd.f32 %v803_v55, %v802_v44  ;;  %v409_v12 = vmul.f32 %v303_v0, %v1350_v1  ;;  %v702_v16 = vsub.f32 %v686_v39, %v694_v5 }
 0x182   : > { %v730_v8 = vrot.slane %v729_v59, 2  ;;  %v810_v9 = vrot.slane %v809_v60, 2  ;;  %v782_v17 = vadd.f32 %v774_v6, %v766_v56  ;;  %v695_v20 = vmul.f32 %v667_v2, %v1406_v47 }
 0x183   : > { %v725_v13 = vrot.slane %v724_v3, 1  ;;  %v805_v15 = vrot.slane %v804_v4, 1  ;;  %v775_v22 = vmul.f32 %v667_v2, %v1399_v40  ;;  %v734_v27 = vsel %vm433_vm1, %v702_v16, 0.0 }
 0x184   : > { %v731_v18 = vadd.f32 %v730_v8, %v729_v59  ;;  %v811_v19 = vadd.f32 %v810_v9, %v809_v60  ;;  %v310_v23 = vpop.permute.xlu0 %309  ;;  %v674_v25 = vpop.permute.xlu1 %673  ;;  %v814_v28 = vsel %vm433_vm1, %v782_v17, 0.0  ;;  %v490_v29 = vmul.f32 %v303_v0, %v1374_v21 }
 0x185   : > { %v1420_v26 = vadd.f32 %v725_v13, %v724_v3  ;;  %v735_v32 = vrot.slane %v734_v27, 4  ;;  %v815_v33 = vrot.slane %v814_v28, 4  ;;  %v1430_v36 = vadd.f32 %v805_v15, %v804_v4 }
 0x186   : > { %v732_v30 = vrot.slane %v731_v18, 1  ;;  %v812_v31 = vrot.slane %v811_v19, 1  ;;  %v703_v37 = vsub.f32 %v687_v57, %v695_v20  ;;  %v783_v39 = vadd.f32 %v775_v22, %v767_v63 }
 0x187   : > { %v410_v41 = vmul.f32 %v310_v23, %v1326_v53  ;;  %v736_v43 = vadd.f32 %v735_v32, %v734_v27  ;;  %v816_v44 = vadd.f32 %v815_v33, %v814_v28  ;;  %v491_v45 = vmul.f32 %v310_v23, %v1331_v54 }
 0x188   : > { %v1433_v42 = vadd.f32 %v732_v30, %v731_v18  ;;  %v317_v48 = vpop.permute.xlu0 %316  ;;  %v359_v49 = vpop.permute.xlu1 %358  ;;  %v1441_v50 = vadd.f32 %v812_v31, %v811_v19  ;;  %v741_v51 = vsel %vm433_vm1, %v703_v37, 0.0  ;;  %v821_v52 = vsel %vm433_vm1, %v783_v39, 0.0 }
 0x189   : > { %v1446_v55 = vmul.f32 %v674_v25, %v1428_v34  ;;  %v737_v56 = vrot.slane %v736_v43, 2  ;;  %v817_v57 = vrot.slane %v816_v44, 2  ;;  %v742_v59 = vrot.slane %v741_v51, 4 }
 0x18a   : > { %v822_v60 = vrot.slane %v821_v52, 4  ;;  %v1449_v63 = vmul.f32 %v674_v25, %v1439_v46  ;;  %v1452_v0 = vmul.f32 %v317_v48, %v1340_v61  ;;  %v417_v2 = vmul.f32 %v359_v49, %v1374_v21 }
 0x18b   : > { %v498_v3 = vmul.f32 %v359_v49, %v1350_v1  ;;  %v738_v4 = vadd.f32 %v737_v56, %v736_v43  ;;  %v818_v5 = vadd.f32 %v817_v57, %v816_v44  ;;  %v743_v6 = vadd.f32 %v742_v59, %v741_v51 }
 0x18c   : > { %v823_v8 = vadd.f32 %v822_v60, %v821_v52  ;;  %v324_v9 = vpop.permute.xlu0 %323  ;;  %v366_v13 = vpop.permute.xlu1 %365  ;;  %v492_v15 = vmul.f32 %v317_v48, %v1345_v62  ;;  %v425_v16 = vsub.f32 %v409_v12, %v417_v2 }
 0x18d   : > { %v506_v17 = vadd.f32 %v498_v3, %v490_v29  ;;  %v1458_v18 = vmul.f32 %v324_v9, %v1359_v10  ;;  %v739_v19 = vrot.slane %v738_v4, 1  ;;  %v819_v20 = vrot.slane %v818_v5, 1 }
 0x18e   : > { %v744_v22 = vrot.slane %v743_v6, 2  ;;  %v824_v23 = vrot.slane %v823_v8, 2  ;;  %v434_v25 = vsel %vm433_vm1, %v425_v16, 0.0  ;;  %v418_v28 = vmul.f32 %v366_v13, %v1331_v54 }
 0x18f   : > { %v514_v27 = vsel %vm433_vm1, %v506_v17, 0.0  ;;  %v499_v30 = vmul.f32 %v366_v13, %v1326_v53  ;;  %v1464_v31 = vadd.f32 %v739_v19, %v738_v4  ;;  %v493_v29 = vmul.f32 %v324_v9, %v1364_v11 }
 0x190   : > { %v745_v32 = vadd.f32 %v744_v22, %v743_v6  ;;  %v825_v12 = vadd.f32 %v824_v23, %v823_v8  ;;  %v331_v33 = vpop.permute.xlu0 %330  ;;  %v373_v37 = vpop.permute.xlu1 %372  ;;  %v435_v39 = vrot.slane %v434_v25, 4  ;;  %v515_v43 = vrot.slane %v514_v27, 4 }
 0x191   : > { %v426_v44 = vsub.f32 %v410_v41, %v418_v28  ;;  %v507_v48 = vadd.f32 %v499_v30, %v491_v45  ;;  %v1467_v49 = vadd.f32 %v819_v20, %v818_v5  ;;  %v1470_v54 = vmul.f32 %v331_v33, %v1381_v24 }
 0x192   : > { %v746_v51 = vrot.slane %v745_v32, 1  ;;  %v826_v52 = vrot.slane %v825_v12, 1  ;;  %v436_v53 = vadd.f32 %v435_v39, %v434_v25  ;;  %v516_v56 = vadd.f32 %v515_v43, %v514_v27 }
 0x193   : > { %v441_v57 = vsel %vm433_vm1, %v426_v44, 0.0  ;;  %v521_v59 = vsel %vm433_vm1, %v507_v48, 0.0  ;;  %v494_v41 = vmul.f32 %v331_v33, %v1393_v38  ;;  %v419_v6 = vmul.f32 %v373_v37, %v1345_v62 }
 0x194   : > { %v1474_v60 = vadd.f32 %v746_v51, %v745_v32  ;;  %v442_v2 = vrot.slane %v441_v57, 4  ;;  %v522_v3 = vrot.slane %v521_v59, 4  ;;  %v338_v45 = vpop.permute.xlu0 %337  ;;  %v437_v4 = vrot.slane %v436_v53, 2  ;;  %v380_v9 = vpop.permute.xlu1 %379 }
 0x195   : > { %v517_v5 = vrot.slane %v516_v56, 2  ;;  %v500_v8 = vmul.f32 %v373_v37, %v1340_v61  ;;  %v1479_v13 = vadd.f32 %v826_v52, %v825_v12  ;;  %v1482_v19 = vmul.f32 %v338_v45, %v1399_v40 }
 0x196   : > { %v443_v16 = vadd.f32 %v442_v2, %v441_v57  ;;  %v523_v17 = vadd.f32 %v522_v3, %v521_v59  ;;  %v438_v20 = vadd.f32 %v437_v4, %v436_v53  ;;  %v427_v23 = vsub.f32 %v1452_v0, %v419_v6 }
 0x197   : > { %v518_v22 = vadd.f32 %v517_v5, %v516_v56  ;;  %v508_v25 = vadd.f32 %v500_v8, %v492_v15  ;;  %v420_v30 = vmul.f32 %v380_v9, %v1364_v11  ;;  %v501_v62 = vmul.f32 %v380_v9, %v1359_v10 }
 0x198   : > { %v444_v27 = vrot.slane %v443_v16, 2  ;;  %v524_v28 = vrot.slane %v523_v17, 2  ;;  %v345_v61 = vpop.permute.xlu0 %344  ;;  %v439_v32 = vrot.slane %v438_v20, 1  ;;  %v448_v33 = vsel %vm433_vm1, %v427_v23, 0.0  ;;  %v387_v57 = vpop.permute.xlu1 %386 }
 0x199   : > { %v519_v12 = vrot.slane %v518_v22, 1  ;;  %v528_v37 = vsel %vm433_vm1, %v508_v25, 0.0  ;;  %v449_v44 = vrot.slane %v448_v33, 4  ;;  %v495_v0 = vmul.f32 %v338_v45, %v1406_v47 }
 0x19a   : > { %v445_v39 = vadd.f32 %v444_v27, %v443_v16  ;;  %v525_v43 = vadd.f32 %v524_v28, %v523_v17  ;;  %v529_v48 = vrot.slane %v528_v37, 4  ;;  %v440_v51 = vadd.f32 %v439_v32, %v438_v20  ;;  %v1501_v20 = vld [vmem:[%s1666_s2 + $0x1c] sm:$0xf] }
 0x19b   : > { %v428_v15 = vsub.f32 %v1458_v18, %v420_v30  ;;  %v509_v52 = vadd.f32 %v501_v62, %v493_v29  ;;  %v450_v10 = vadd.f32 %v449_v44, %v448_v33  ;;  %v520_v59 = vadd.f32 %v519_v12, %v518_v22 }
 0x19c   : > { %v446_v11 = vrot.slane %v445_v39, 1  ;;  %v526_v53 = vrot.slane %v525_v43, 1  ;;  %v530_v56 = vadd.f32 %v529_v48, %v528_v37  ;;  %v1494_v4 = vmul.f32 %v345_v61, %v1439_v46  ;;  %v352_v5 = vpop.permute.xlu0 %351 }
 0x19d   : > { %v455_v2 = vsel %vm433_vm1, %v428_v15, 0.0  ;;  %v535_v3 = vsel %vm433_vm1, %v509_v52, 0.0  ;;  %v451_v45 = vrot.slane %v450_v10, 2  ;;  %v421_v16 = vmul.f32 %v387_v57, %v1393_v38 }
 0x19e   : > { %v447_v6 = vadd.f32 %v446_v11, %v445_v39  ;;  %v527_v8 = vadd.f32 %v526_v53, %v525_v43  ;;  %v531_v9 = vrot.slane %v530_v56, 2  ;;  %v456_v18 = vrot.slane %v455_v2, 4  ;;  %v394_v39 = vpop.permute.xlu1 %393 }
 0x19f   : > { %v536_v29 = vrot.slane %v535_v3, 4  ;;  %v502_v17 = vmul.f32 %v387_v57, %v1381_v24  ;;  %v452_v23 = vadd.f32 %v451_v45, %v450_v10  ;;  %v496_v27 = vmul.f32 %v345_v61, %v1428_v34  ;;  %v1511_v24 = vld [vmem:[%s1667_s3 + $0x1c] sm:$0xf] }
 0x1a0   : > { %v1504_v22 = vsel %vm850_vm2, %v447_v6, %v440_v51  ;;  %v532_v25 = vadd.f32 %v531_v9, %v530_v56  ;;  %v457_v28 = vadd.f32 %v456_v18, %v455_v2  ;;  %v429_v62 = vsub.f32 %v1470_v54, %v421_v16 }
 0x1a1   : > { %v537_v30 = vadd.f32 %v536_v29, %v535_v3  ;;  %v510_v32 = vadd.f32 %v502_v17, %v494_v41  ;;  %v1514_v38 = vsel %vm850_vm2, %v527_v8, %v520_v59  ;;  %v453_v12 = vrot.slane %v452_v23, 1  ;;  %v632_v41 = vpop.permute.xlu0 %631 }
 0x1a2   : > { %v533_v33 = vrot.slane %v532_v25, 1  ;;  %v1517_v37 = vmul.f32 %v352_v5, %v1501_v20  ;;  %v458_v61 = vrot.slane %v457_v28, 2  ;;  %v462_v44 = vsel %vm433_vm1, %v429_v62, 0.0 }
 0x1a3   : > { %v538_v43 = vrot.slane %v537_v30, 2  ;;  %v542_v54 = vsel %vm433_vm1, %v510_v32, 0.0  ;;  %v1521_v48 = vadd.f32 %v453_v12, %v452_v23  ;;  %v463_v51 = vrot.slane %v462_v44, 4 }
 0x1a4   : > { %v543_v15 = vrot.slane %v542_v54, 4  ;;  %v1524_v52 = vmul.f32 %v352_v5, %v1511_v24  ;;  %v459_v11 = vadd.f32 %v458_v61, %v457_v28  ;;  %v422_v10 = vmul.f32 %v394_v39, %v1406_v47  ;;  %v401_v47 = vpop.permute.xlu1 %400 }
 0x1a5   : > { %v539_v53 = vadd.f32 %v538_v43, %v537_v30  ;;  %v503_v56 = vmul.f32 %v394_v39, %v1399_v40  ;;  %v464_v57 = vadd.f32 %v463_v51, %v462_v44  ;;  %v690_v2 = vmul.f32 %v632_v41, %v1374_v21 }
 0x1a6   : > { %v544_v59 = vadd.f32 %v543_v15, %v542_v54  ;;  %v770_v3 = vmul.f32 %v632_v41, %v1350_v1  ;;  %v460_v6 = vrot.slane %v459_v11, 1  ;;  %v430_v45 = vsub.f32 %v1482_v19, %v422_v10 }
 0x1a7   : > { %v540_v8 = vrot.slane %v539_v53, 1  ;;  %v511_v9 = vadd.f32 %v503_v56, %v495_v0  ;;  %v465_v18 = vrot.slane %v464_v57, 2  ;;  %v698_v29 = vsub.f32 %v1369_v14, %v690_v2 }
 0x1a8   : > { %v545_v5 = vrot.slane %v544_v59, 2  ;;  %v778_v16 = vadd.f32 %v770_v3, %v1388_v35  ;;  %v1533_v17 = vadd.f32 %v533_v33, %v532_v25  ;;  %v1535_v40 = vadd.f32 %v460_v6, %v459_v11  ;;  %v618_v11 = vpop.permute.xlu0 %617 }
 0x1a9   : > { %v469_v21 = vsel %vm433_vm1, %v430_v45, 0.0  ;;  %v549_v1 = vsel %vm433_vm1, %v511_v9, 0.0  ;;  %v466_v23 = vadd.f32 %v465_v18, %v464_v57  ;;  %v706_v0 = vsel %vm433_vm1, %v698_v29, 0.0 }
 0x1aa   : > { %v546_v28 = vadd.f32 %v545_v5, %v544_v59  ;;  %v470_v30 = vrot.slane %v469_v21, 4  ;;  %v550_v19 = vrot.slane %v549_v1, 4  ;;  %v786_v62 = vsel %vm433_vm1, %v778_v16, 0.0  ;;  %v408_v16 = vpop.permute.xlu1 %407 }
 0x1ab   : > { %v423_v14 = vmul.f32 %v401_v47, %v1428_v34  ;;  %v504_v35 = vmul.f32 %v401_v47, %v1439_v46  ;;  %v1543_v25 = vadd.f32 %v540_v8, %v539_v53  ;;  %v467_v32 = vrot.slane %v466_v23, 1 }
 0x1ac   : > { %v471_v12 = vadd.f32 %v470_v30, %v469_v21  ;;  %v551_v33 = vadd.f32 %v550_v19, %v549_v1  ;;  %v707_v39 = vrot.slane %v706_v0, 4  ;;  %v787_v61 = vrot.slane %v786_v62, 4 }
 0x1ad   : > { %v431_v43 = vsub.f32 %v1494_v4, %v423_v14  ;;  %v512_v44 = vadd.f32 %v504_v35, %v496_v27  ;;  %v1546_v54 = vadd.f32 %v467_v32, %v466_v23  ;;  %v547_v41 = vrot.slane %v546_v28, 1 }
 0x1ae   : > { %v472_v51 = vrot.slane %v471_v12, 2  ;;  %v552_v15 = vrot.slane %v551_v33, 2  ;;  %v708_v10 = vadd.f32 %v707_v39, %v706_v0  ;;  %v788_v56 = vadd.f32 %v787_v61, %v786_v62 }
 0x1af   : > { %v476_v57 = vsel %vm433_vm1, %v431_v43, 0.0  ;;  %v556_v53 = vsel %vm433_vm1, %v512_v44, 0.0  ;;  %v688_v4 = vmul.f32 %v618_v11, %v1439_v46  ;;  %v768_v27 = vmul.f32 %v618_v11, %v1428_v34  ;;  %v625_v43 = vpop.permute.xlu0 %624  ;;  %v681_v11 = vpop.permute.xlu1 %680 }
 0x1b0   : > { %v473_v59 = vadd.f32 %v472_v51, %v471_v12  ;;  %v553_v2 = vadd.f32 %v552_v15, %v551_v33  ;;  %v477_v3 = vrot.slane %v476_v57, 4  ;;  %v557_v6 = vrot.slane %v556_v53, 4 }
 0x1b1   : > { %v709_v8 = vrot.slane %v708_v10, 2  ;;  %v789_v45 = vrot.slane %v788_v56, 2  ;;  %v704_v1 = vsub.f32 %v688_v4, %v1446_v55  ;;  %v784_v23 = vadd.f32 %v1449_v63, %v768_v27 }
 0x1b2   : > { %v474_v9 = vrot.slane %v473_v59, 1  ;;  %v554_v18 = vrot.slane %v553_v2, 1  ;;  %v478_v5 = vadd.f32 %v477_v3, %v476_v57  ;;  %v558_v29 = vadd.f32 %v557_v6, %v556_v53 }
 0x1b3   : > { %v710_v47 = vadd.f32 %v709_v8, %v708_v10  ;;  %v790_v21 = vadd.f32 %v789_v45, %v788_v56  ;;  %v1554_v30 = vadd.f32 %v547_v41, %v546_v28  ;;  %v748_v14 = vsel %vm433_vm1, %v704_v1, 0.0 }
 0x1b4   : > { %v1556_v19 = vadd.f32 %v474_v9, %v473_v59  ;;  %v479_v0 = vrot.slane %v478_v5, 2  ;;  %v559_v62 = vrot.slane %v558_v29, 2  ;;  %v828_v35 = vsel %vm433_vm1, %v784_v23, 0.0 }
 0x1b5   : > { %v711_v46 = vrot.slane %v710_v47, 1  ;;  %v791_v34 = vrot.slane %v790_v21, 1  ;;  %v749_v33 = vrot.slane %v748_v14, 4  ;;  %v829_v39 = vrot.slane %v828_v35, 4 }
 0x1b6   : > { %v480_v32 = vadd.f32 %v479_v0, %v478_v5  ;;  %v560_v12 = vadd.f32 %v559_v62, %v558_v29  ;;  %v555_v55 = vadd.f32 %v554_v18, %v553_v2  ;;  %v424_v28 = vmul.f32 %v408_v16, %v1511_v24 }
 0x1b7   : > { %v712_v63 = vadd.f32 %v711_v46, %v710_v47  ;;  %v505_v61 = vmul.f32 %v408_v16, %v1501_v20  ;;  %v792_v44 = vadd.f32 %v791_v34, %v790_v21  ;;  %v750_v51 = vadd.f32 %v749_v33, %v748_v14 }
 0x1b8   : > { %v481_v41 = vrot.slane %v480_v32, 1  ;;  %v830_v15 = vadd.f32 %v829_v39, %v828_v35  ;;  %v561_v56 = vrot.slane %v560_v12, 1  ;;  %v432_v57 = vsub.f32 %v1517_v37, %v424_v28 }
 0x1b9   : > { %v889_v10 = vsel %vm850_vm2, %v1410_v58, %v712_v63  ;;  %v513_v53 = vadd.f32 %v505_v61, %v1524_v52  ;;  %v751_v59 = vrot.slane %v750_v51, 2  ;;  %v689_v3 = vmul.f32 %v625_v43, %v1501_v20 }
 0x1ba   : > { %v831_v2 = vrot.slane %v830_v15, 2  ;;  %v769_v6 = vmul.f32 %v625_v43, %v1511_v24  ;;  %v483_v8 = vsel %vm433_vm1, %v432_v57, 0.0  ;;  %v697_v4 = vmul.f32 %v681_v11, %v1511_v24 }
 0x1bb   : > { %v563_v45 = vsel %vm433_vm1, %v513_v53, 0.0  ;;  %v777_v58 = vmul.f32 %v681_v11, %v1501_v20  ;;  %v752_v27 = vadd.f32 %v751_v59, %v750_v51  ;;  %v484_v37 = vrot.slane %v483_v8, 4 }
 0x1bc   : > { %v832_v9 = vadd.f32 %v831_v2, %v830_v15  ;;  %v564_v18 = vrot.slane %v563_v45, 4  ;;  %v905_v52 = vsel %vm850_vm2, %v1415_v7, %v792_v44  ;;  %v705_v5 = vsub.f32 %v689_v3, %v697_v4 }
 0x1bd   : > { %v785_v29 = vadd.f32 %v777_v58, %v769_v6  ;;  %v482_v16 = vadd.f32 %v481_v41, %v480_v32  ;;  %v753_v47 = vrot.slane %v752_v27, 1  ;;  %v485_v21 = vadd.f32 %v484_v37, %v483_v8 }
 0x1be   : > { %v565_v1 = vadd.f32 %v564_v18, %v563_v45  ;;  %v562_v23 = vadd.f32 %v561_v56, %v560_v12  ;;  %v833_v0 = vrot.slane %v832_v9, 1  ;;  %v755_v24 = vsel %vm433_vm1, %v705_v5, 0.0 }
 0x1bf   : > { %v835_v20 = vsel %vm433_vm1, %v785_v29, 0.0  ;;  %v853_v62 = vsel %vm852_vm3, %v1521_v48, %v1504_v22  ;;  %v754_v46 = vadd.f32 %v753_v47, %v752_v27  ;;  %v486_v34 = vrot.slane %v485_v21, 2 }
 0x1c0   : > { %v566_v7 = vrot.slane %v565_v1, 2  ;;  %v874_v14 = vsel %vm852_vm3, %v1533_v17, %v1514_v38  ;;  %v756_v35 = vrot.slane %v755_v24, 4  ;;  %v836_v32 = vrot.slane %v835_v20, 4 }
 0x1c1   : > { %v855_v12 = vsel %vm854_vm4, %v1535_v40, %v853_v62  ;;  %v875_v33 = vsel %vm854_vm4, %v1543_v25, %v874_v14  ;;  %v487_v39 = vadd.f32 %v486_v34, %v485_v21 }
 0x1c2   : > { %v567_v63 = vadd.f32 %v566_v7, %v565_v1  ;;  %v857_v22 = vsel %vm856_vm5, %v1546_v54, %v855_v12  ;;  %v876_v48 = vsel %vm856_vm5, %v1554_v30, %v875_v33  ;;  %v757_v28 = vadd.f32 %v756_v35, %v755_v24 }
 0x1c3   : > { %v837_v61 = vadd.f32 %v836_v32, %v835_v20  ;;  %v859_v38 = vsel %vm858_vm6, %v1556_v19, %v857_v22  ;;  %v877_v17 = vsel %vm858_vm6, %v555_v55, %v876_v48  ;;  %v488_v43 = vrot.slane %v487_v39, 1 }
 0x1c4   : > { %v568_v40 = vrot.slane %v567_v63, 1  ;;  %v861_v44 = vsel %vm860_vm7, %v482_v16, %v859_v38  ;;  %v878_v25 = vsel %vm860_vm7, %v562_v23, %v877_v17  ;;  %v758_v41 = vrot.slane %v757_v28, 2 }
 0x1c5   : > { %v838_v51 = vrot.slane %v837_v61, 2  ;;  %v890_v54 = vsel %vm852_vm3, %v1420_v26, %v889_v10  ;;  %v906_v30 = vsel %vm852_vm3, %v1430_v36, %v905_v52  ;;  %v489_v15 = vadd.f32 %v488_v43, %v487_v39 }
 0x1c6   : > { %v569_v11 = vadd.f32 %v568_v40, %v567_v63  ;;  %v891_v19 = vsel %vm854_vm4, %v1433_v42, %v890_v54  ;;  %v907_v55 = vsel %vm854_vm4, %v1441_v50, %v906_v30  ;;  %v759_v56 = vadd.f32 %v758_v41, %v757_v28 }
 0x1c7   : > { %v839_v57 = vadd.f32 %v838_v51, %v837_v61  ;;  %v892_v53 = vsel %vm856_vm5, %v1464_v31, %v891_v19  ;;  %v908_v59 = vsel %vm856_vm5, %v1467_v49, %v907_v55  ;;  %v834_v26 = vadd.f32 %v833_v0, %v832_v9 }
 0x1c8   : > { %v863_v10 = vsel %vm862_vm8, %v489_v15, %v861_v44  ;;  %v879_v36 = vsel %vm862_vm8, %v569_v11, %v878_v25  ;;  %v893_v2 = vsel %vm858_vm6, %v1474_v60, %v892_v53  ;;  %v760_v42 = vrot.slane %v759_v56, 1 }
 0x1c9   : > { %v840_v3 = vrot.slane %v839_v57, 1  ;;  %v913_v50 = vpack.c.bf16 %v879_v36, %v863_v10  ;;  %v909_v6 = vsel %vm858_vm6, %v1479_v13, %v908_v59  ;;  %v894_v49 = vsel %vm860_vm7, %v754_v46, %v893_v2 }
 0x1ca   : > { %v761_v31 = vadd.f32 %v760_v42, %v759_v56  ;;  %v910_v45 = vsel %vm860_vm7, %v834_v26, %v909_v6 }
 0x1cb   : > { %915 = vxpose.xlu0.c.b16.start [1/2] (short) (narrow) %v913_v50, 16  ;;  %v841_v8 = vadd.f32 %v840_v3, %v839_v57 }
 0x1cc   : > { %v895_v4 = vsel %vm862_vm8, %v761_v31, %v894_v49 }
 0x1cd   : > { %v911_v58 = vsel %vm862_vm8, %v841_v8, %v910_v45 }
 0x1ce   : > { %v914_v60 = vpack.c.bf16 %v911_v58, %v895_v4 }
 0x1d0   : > { %916 = vxpose.xlu0.c.b16.end [2/2] (short) (narrow) %v914_v60, 16 }
 0x232   : > { %v923_v27 = vpop.trf.xlu0 }
 0x233   : > { %1094 = vmatmul.mubr.msk.bf16.vlgmr.msra.gmra.mrb[0].mxu1 %vm931_vm9, %v923_v27 }
 0x306   : > { %v969_v13 = vpop.f32.mrb[0].mxu1 }
 0x307   : > { %975 = vst [vmem:[%s203_s10] sm:$0xf] %v969_v13  ;;  %v1095_v9 = vpop.f32.mrb[1].mxu1 }
 0x308   : > { %v972_v37 = vpop.f32.mrb[2].mxu1 }
 0x309   : > { %1154 = shalt.err (!%p1151_p3)
}
 0x30a   : > { %s1155_s29 = scalar_lea.hbm %s1624_s20, 64  ;;  %s1159_s6 = scalar_lea.hbm %s1668_s4, 128 }
 0x30b   : > { %p1156_p4 = scmp.ne.s32.totalorder %s1624_s20, %s1155_s29  ;;  %p1160_p9 = scmp.lt.u32.totalorder %s1624_s20, %s1668_s4 }
 0x30c   : > { %p1161_p10 = scmp.lt.u32.totalorder %s1159_s6, %s1155_s29  ;;  %p1163_p12 = scmp.lt.u32.totalorder %s1155_s29, %s1624_s20 }
 0x30d   : > { %p1157_p7 = pnand %p1156_p4, %p1271_p5 }
 0x30e   : > { %p1162_p11 = por %p1161_p10, %p1160_p9 }
 0x30f   : > { %p1158_p8 = pneg %p1157_p7 }
 0x310   : > { %p1164_p13 = por %p1163_p12, %p1162_p11 }
 0x312   : > { %p1165_p0 = pnand %p1164_p13, %p1158_p8 }
 0x314   : > { %1168 = shalt.err (!%p1165_p0)
}
 0x315   : > { %1097 = dma.vmem_to_hbm [thread:$0]  (%p1271_p5), %s1619_s11, 64, %s1624_s20, %s977_s22   ;;  %v1096_v18 = vpop.f32.mrb[3].mxu1 }
 0x316 PF: > { %p1103_p1 = scmp.ge.s32.totalorder %s1203_s18, 2  ;;  %s1002_s9 = sand.u32 1, %s1191_s15  }
 0x317   : > { %s1003_s10 = scalar_lea.sflag [#allocation3], %s1002_s9 }
 0x318   : > { %p1100_p2 = pnand %p1103_p1, %p1275_p6 }
 0x31a   : > { %1186 = dma.done.wait (!%p1100_p2), %s1003_s10, 64  }
 0x31b   : > { %1188 = vsyncadd (!%p1100_p2), %s1003_s10, 4294967232  ;;  %p14_p3 = scmp.ge.s32.totalorder %s1258_s21, 4   ;;  %s1671_s15 = smov %s1195_s16 }
 0x31c   : > { %s1672_s16 = smov %s1199_s17  ;;  %s1673_s17 = smov %s1269_s24 }
 0x31d   : > { %s1674_s18 = smov %s1258_s21  ;;  %16 = sbr.rel (!%p14_p3) target bundleno = 3 (0x3), region = 74 }
 0x324   :  { %1008 = vsyncpa [#allocation3], 1 }
 0x325   :  { %1010 = vsyncpa [#allocation3 + $0x1], 1 }

</bundles_post_ra>
